<compile_context>
chip_gen: v5e
topology: v5e:2x2
jax: 0.10.0
libtpu: 0.0.40
codegen_flags: <defaults>
</compile_context>

<pallas_src>
import functools

import jax
import jax.numpy as jnp
import numpy as np
from jax.experimental import pallas as pl
from jax.experimental.pallas import tpu as pltpu


# --------------------------------------------------------------------------
# Kernel
# --------------------------------------------------------------------------
def _decoder_kernel(dm_ref, w_in_ref, b_in_ref, w_lstm_ref, b_lstm_ref,
                    w_out_ref, b_out_ref, h0_ref, c0_ref,
                    out_ref, hid_ref,
                    h_st, c_st, prev_out, hist,
                    *, nlayer, nhid, skip_len):
    t = pl.program_id(0)
    ring = skip_len + 1

    def out_layer(h):
        # output_layer: Linear(nhid -> ninp), bf16 MXU matmul, f32 accumulate
        return (jnp.dot(h.astype(w_out_ref.dtype), w_out_ref[...],
                        preferred_element_type=jnp.float32) + b_out_ref[...])

    @pl.when(t == 0)
    def _init():
        # Load initial state into resident VMEM scratch, emit outputs[0].
        h_st[...] = h0_ref[...]
        c_st[...] = c0_ref[...]
        hist[...] = jnp.zeros_like(hist)
        h_last = h0_ref[nlayer - 1]                       # (B, nhid)
        out0 = out_layer(h_last)                          # (B, ninp)
        out_ref[0] = out0.astype(out_ref.dtype)
        hid_ref[0] = h_last.astype(hid_ref.dtype)
        prev_out[...] = out0
        hist[0] = h_last                                  # all_hiddens[0]

    @pl.when(t > 0)
    def _step():
        # (1) input_layer on the previous decoder output (kept in VMEM scratch)
        x = (jnp.dot(prev_out[...].astype(w_in_ref.dtype), w_in_ref[...],
                     preferred_element_type=jnp.float32) + b_in_ref[...])

        # (2) skip-connection combine of the last layer's hidden state.
        #     dm[t] = (1, 0) for steps where PyTorch does not combine, so this
        #     is unconditional / branch free.
        slot = t % ring
        w1 = dm_ref[t, 0]
        w2 = dm_ref[t, 1]
        h_st[nlayer - 1] = w1 * h_st[nlayer - 1] + w2 * hist[slot]

        # (3) stacked LSTM cells: one fused [x‖h] @ [WiT;WhT] matmul per layer
        inp = x
        for l in range(nlayer):
            h_l = h_st[l]
            c_l = c_st[l]
            xh = jnp.concatenate([inp, h_l], axis=1).astype(w_lstm_ref.dtype)
            gates = (jnp.dot(xh, w_lstm_ref[l],
                             preferred_element_type=jnp.float32)
                     + b_lstm_ref[l])                     # (B, 4*nhid) f32
            # Full-width EUP passes; sigmoid via a single tanh.
            sig = 0.5 * jnp.tanh(0.5 * gates) + 0.5
            tnh = jnp.tanh(gates)
            i_g = sig[:, 0 * nhid:1 * nhid]
            f_g = sig[:, 1 * nhid:2 * nhid]
            g_g = tnh[:, 2 * nhid:3 * nhid]
            o_g = sig[:, 3 * nhid:4 * nhid]
            cy = f_g * c_l + i_g * g_g
            hy = o_g * jnp.tanh(cy)
            c_st[l] = cy
            h_st[l] = hy
            inp = hy

        # (4) output_layer + bookkeeping for the next step
        out = out_layer(inp)
        out_ref[0] = out.astype(out_ref.dtype)
        hid_ref[0] = inp.astype(hid_ref.dtype)
        prev_out[...] = out
        hist[slot] = inp                                   # all_hiddens[t]


# --------------------------------------------------------------------------
# Host-side (done once, not per call): weight transposes, bias fusion, bf16.
# --------------------------------------------------------------------------
def prepare_decoder_params(raw, nlayer, compute_dtype=jnp.bfloat16):
    w_lstm = jnp.stack(
        [jnp.concatenate([raw["w_i2h"][l].T, raw["w_h2h"][l].T], axis=0)
         for l in range(nlayer)], axis=0).astype(compute_dtype)      # (L, 2H, 4H)
    b_lstm = jnp.stack(
        [(raw["b_i2h"][l] + raw["b_h2h"][l]).reshape(1, -1)
         for l in range(nlayer)], axis=0).astype(jnp.float32)        # (L, 1, 4H)
    return {
        "w_in_t": raw["w_in"].T.astype(compute_dtype),               # (ninp, nhid)
        "b_in": raw["b_in"].reshape(1, -1).astype(jnp.float32),      # (1, nhid)
        "w_lstm": w_lstm,
        "b_lstm": b_lstm,
        "w_out_t": raw["w_out"].T.astype(compute_dtype),             # (nhid, ninp)
        "b_out": raw["b_out"].reshape(1, -1).astype(jnp.float32),    # (1, ninp)
    }


def build_decode_mask_weights(all_decode_masks, timestep, skip_len):
    """dm[t] = (w1, w2) applied at grid step t (loop index t-1); identity (1,0)
    for steps where the PyTorch code performs no combine."""
    dm = np.zeros((timestep, 2), dtype=np.float32)
    dm[:, 0] = 1.0
    for tt in range(timestep - 1):
        if tt >= skip_len:
            w1, w2 = all_decode_masks[tt]
            if w1 and w2:
                w1, w2 = 0.5, 0.5
            dm[tt + 1, 0] = float(w1)
            dm[tt + 1, 1] = float(w2)
    return jnp.asarray(dm)


# --------------------------------------------------------------------------
# Pallas wrapper
# --------------------------------------------------------------------------
def decoder_forward(prep, dm, h0, c0, timestep, skip_len):
    nlayer, B, nhid = h0.shape
    ninp = prep["w_out_t"].shape[1]

    kernel = functools.partial(_decoder_kernel, nlayer=nlayer, nhid=nhid,
                               skip_len=skip_len)

    resident = lambda shape: pl.BlockSpec(shape, lambda t: (0,) * len(shape))

    outputs_tm, all_hiddens = pl.pallas_call(
        kernel,
        grid=(timestep,),
        in_specs=[
            pl.BlockSpec(memory_space=pltpu.MemorySpace.SMEM),   # dm (T, 2)
            resident((ninp, nhid)),                              # w_in_t  (bf16)
            resident((1, nhid)),                                 # b_in    (f32)
            resident((nlayer, 2 * nhid, 4 * nhid)),              # w_lstm  (bf16)
            resident((nlayer, 1, 4 * nhid)),                     # b_lstm  (f32)
            resident((nhid, ninp)),                              # w_out_t (bf16)
            resident((1, ninp)),                                 # b_out   (f32)
            resident((nlayer, B, nhid)),                         # h0
            resident((nlayer, B, nhid)),                         # c0
        ],
        out_specs=(
            pl.BlockSpec((1, B, ninp), lambda t: (t, 0, 0)),     # outputs (T,B,ninp)
            pl.BlockSpec((1, B, nhid), lambda t: (t, 0, 0)),     # all_hiddens
        ),
        out_shape=(
            jax.ShapeDtypeStruct((timestep, B, ninp), jnp.float32),
            jax.ShapeDtypeStruct((timestep, B, nhid), jnp.float32),
        ),
        scratch_shapes=[
            pltpu.VMEM((nlayer, B, nhid), jnp.float32),          # h state
            pltpu.VMEM((nlayer, B, nhid), jnp.float32),          # c state
            pltpu.VMEM((B, ninp), jnp.float32),                  # previous output
            pltpu.VMEM((skip_len + 1, B, nhid), jnp.float32),    # hidden ring buf
        ],
        compiler_params=pltpu.CompilerParams(
            dimension_semantics=("arbitrary",)),
    )(dm, prep["w_in_t"], prep["b_in"], prep["w_lstm"], prep["b_lstm"],
      prep["w_out_t"], prep["b_out"], h0, c0)

    # match torch.stack(outputs, 1): (B, T, ninp); all_hiddens stays (T, B, nhid)
    return jnp.transpose(outputs_tm, (1, 0, 2)), all_hiddens


# --------------------------------------------------------------------------
# Pure-JAX reference mirroring the PyTorch module (same prepared bf16 weights)
# --------------------------------------------------------------------------
def decoder_forward_ref(prep, dm, h0, c0, timestep, skip_len):
    nlayer, B, nhid = h0.shape

    def mm(a, w):
        return jnp.dot(a.astype(w.dtype), w, preferred_element_type=jnp.float32)

    def sig(x):
        return 0.5 * jnp.tanh(0.5 * x) + 0.5

    h = [h0[l] for l in range(nlayer)]
    c = [c0[l] for l in range(nlayer)]
    outputs = [mm(h[-1], prep["w_out_t"]) + prep["b_out"]]
    all_h = [h[-1]]
    for tt in range(timestep - 1):
        x = mm(outputs[-1], prep["w_in_t"]) + prep["b_in"]
        if tt >= skip_len:
            w1 = dm[tt + 1, 0]
            w2 = dm[tt + 1, 1]
            h[-1] = w1 * h[-1] + w2 * all_h[tt - skip_len]
        inp = x
        for l in range(nlayer):
            xh = jnp.concatenate([inp, h[l]], axis=1)
            gates = mm(xh, prep["w_lstm"][l]) + prep["b_lstm"][l]
            i_g = sig(gates[:, 0 * nhid:1 * nhid])
            f_g = sig(gates[:, 1 * nhid:2 * nhid])
            g_g = jnp.tanh(gates[:, 2 * nhid:3 * nhid])
            o_g = sig(gates[:, 3 * nhid:4 * nhid])
            c[l] = f_g * c[l] + i_g * g_g
            h[l] = o_g * jnp.tanh(c[l])
            inp = h[l]
        out = mm(h[-1], prep["w_out_t"]) + prep["b_out"]
        all_h.append(h[-1])
        outputs.append(out)
    return jnp.stack(outputs, 1), jnp.stack(all_h, 0)


# --------------------------------------------------------------------------
# Demo / self-test
# --------------------------------------------------------------------------
if __name__ == "__main__":
    B, NINP, NHID, NLAYER = 8, 16, 32, 2
    T, SKIP = 8, 2

    key = jax.random.PRNGKey(0)
    k = jax.random.split(key, 6 + 4 * NLAYER)

    raw = {
        "w_in": 0.1 * jax.random.normal(k[0], (NHID, NINP), jnp.float32),
        "b_in": 0.1 * jax.random.normal(k[1], (NHID,), jnp.float32),
        "w_out": 0.1 * jax.random.normal(k[2], (NINP, NHID), jnp.float32),
        "b_out": 0.1 * jax.random.normal(k[3], (NINP,), jnp.float32),
        "w_i2h": [], "b_i2h": [], "w_h2h": [], "b_h2h": [],
    }
    for l in range(NLAYER):
        raw["w_i2h"].append(0.1 * jax.random.normal(k[6 + 4 * l], (4 * NHID, NHID), jnp.float32))
        raw["b_i2h"].append(0.1 * jax.random.normal(k[7 + 4 * l], (4 * NHID,), jnp.float32))
        raw["w_h2h"].append(0.1 * jax.random.normal(k[8 + 4 * l], (4 * NHID, NHID), jnp.float32))
        raw["b_h2h"].append(0.1 * jax.random.normal(k[9 + 4 * l], (4 * NHID,), jnp.float32))

    h0 = jax.random.normal(k[4], (NLAYER, B, NHID), jnp.float32)
    c0 = jax.random.normal(k[5], (NLAYER, B, NHID), jnp.float32)

    # decode masks per loop step (only indices >= skip_len are ever used)
    all_decode_masks = [(1, 0), (0, 1), (1, 1), (1, 0), (0, 1), (1, 1), (0, 1)]

    prep = prepare_decoder_params(raw, NLAYER)                 # hoisted, done once
    dm = build_decode_mask_weights(all_decode_masks, T, SKIP)

    outputs, all_hiddens = decoder_forward(prep, dm, h0, c0, T, SKIP)
    jax.block_until_ready((outputs, all_hiddens))

    ref_out, ref_hid = decoder_forward_ref(prep, np.asarray(dm), h0, c0, T, SKIP)

    assert outputs.shape == (B, T, NINP), outputs.shape
    assert all_hiddens.shape == (T, B, NHID), all_hiddens.shape
    assert jnp.allclose(outputs, ref_out, atol=2e-3, rtol=2e-3), "outputs mismatch"
    assert jnp.allclose(all_hiddens, ref_hid, atol=2e-3, rtol=2e-3), "all_hiddens mismatch"

    print("KERNEL_OK")
</pallas_src>

<mosaic_0001>
module attributes {stable_mosaic.version = 11 : i64} {
  func.func @_decoder_kernel(%arg0: i32, %arg1: memref<8x2xf32, #tpu.memory_space<smem>>, %arg2: memref<16x32xbf16, #tpu.memory_space<vmem>>, %arg3: memref<1x32xf32, #tpu.memory_space<vmem>>, %arg4: memref<2x64x128xbf16, #tpu.memory_space<vmem>>, %arg5: memref<2x1x128xf32, #tpu.memory_space<vmem>>, %arg6: memref<32x16xbf16, #tpu.memory_space<vmem>>, %arg7: memref<1x16xf32, #tpu.memory_space<vmem>>, %arg8: memref<2x8x32xf32, #tpu.memory_space<vmem>>, %arg9: memref<2x8x32xf32, #tpu.memory_space<vmem>>, %arg10: memref<1x8x16xf32, #tpu.memory_space<vmem>>, %arg11: memref<1x8x32xf32, #tpu.memory_space<vmem>>, %arg12: memref<2x8x32xf32, #tpu.memory_space<vmem>>, %arg13: memref<2x8x32xf32, #tpu.memory_space<vmem>>, %arg14: memref<8x16xf32, #tpu.memory_space<vmem>>, %arg15: memref<3x8x32xf32, #tpu.memory_space<vmem>>) attributes {dimension_semantics = [#tpu.dimension_semantics<arbitrary>], iteration_bounds = array<i64: 8>, scalar_prefetch = 0 : i64, scratch_operands = 4 : i64, tpu.core_type = #tpu.core_type<tc>, window_params = [{transform_indices = @transform_0, window_bounds = array<i64: 8, 2>}, {pipeline_mode = #tpu.pipeline_mode<synchronous>, transform_indices = @transform_1, window_bounds = array<i64: 16, 32>}, {pipeline_mode = #tpu.pipeline_mode<synchronous>, transform_indices = @transform_2, window_bounds = array<i64: 1, 32>}, {pipeline_mode = #tpu.pipeline_mode<synchronous>, transform_indices = @transform_3, window_bounds = array<i64: 2, 64, 128>}, {pipeline_mode = #tpu.pipeline_mode<synchronous>, transform_indices = @transform_4, window_bounds = array<i64: 2, 1, 128>}, {pipeline_mode = #tpu.pipeline_mode<synchronous>, transform_indices = @transform_5, window_bounds = array<i64: 32, 16>}, {pipeline_mode = #tpu.pipeline_mode<synchronous>, transform_indices = @transform_6, window_bounds = array<i64: 1, 16>}, {pipeline_mode = #tpu.pipeline_mode<synchronous>, transform_indices = @transform_7, window_bounds = array<i64: 2, 8, 32>}, {pipeline_mode = #tpu.pipeline_mode<synchronous>, transform_indices = @transform_8, window_bounds = array<i64: 2, 8, 32>}, {transform_indices = @transform_9, window_bounds = array<i64: 1, 8, 16>}, {transform_indices = @transform_10, window_bounds = array<i64: 1, 8, 32>}]} {
    %c0_i32 = arith.constant 0 : i32
    %0 = arith.cmpi eq, %arg0, %c0_i32 : i32
    %1 = arith.extui %0 : i1 to i32
    %c0_i32_0 = arith.constant 0 : i32
    %2 = arith.cmpi ne, %1, %c0_i32_0 : i32
    scf.if %2 {
      %c0 = arith.constant 0 : index
      %c0_3 = arith.constant 0 : index
      %c0_4 = arith.constant 0 : index
      %6 = vector.load %arg8[%c0, %c0_3, %c0_4] : memref<2x8x32xf32, #tpu.memory_space<vmem>>, vector<2x8x32xf32>
      %c0_5 = arith.constant 0 : index
      %c0_6 = arith.constant 0 : index
      %c0_7 = arith.constant 0 : index
      %7 = vector.load %arg12[%c0_5, %c0_6, %c0_7] : memref<2x8x32xf32, #tpu.memory_space<vmem>>, vector<2x8x32xf32>
      tpu.vector_store %arg12[%c0_5, %c0_6, %c0_7], %6 {strides = array<i32>} : memref<2x8x32xf32, #tpu.memory_space<vmem>>, vector<2x8x32xf32>,
      %c0_8 = arith.constant 0 : index
      %c0_9 = arith.constant 0 : index
      %c0_10 = arith.constant 0 : index
      %8 = vector.load %arg9[%c0_8, %c0_9, %c0_10] : memref<2x8x32xf32, #tpu.memory_space<vmem>>, vector<2x8x32xf32>
      %c0_11 = arith.constant 0 : index
      %c0_12 = arith.constant 0 : index
      %c0_13 = arith.constant 0 : index
      %9 = vector.load %arg13[%c0_11, %c0_12, %c0_13] : memref<2x8x32xf32, #tpu.memory_space<vmem>>, vector<2x8x32xf32>
      tpu.vector_store %arg13[%c0_11, %c0_12, %c0_13], %8 {strides = array<i32>} : memref<2x8x32xf32, #tpu.memory_space<vmem>>, vector<2x8x32xf32>,
      %cst = arith.constant 0.000000e+00 : f32
      %10 = vector.broadcast %cst : f32 to vector<3x8x32xf32>
      %c0_14 = arith.constant 0 : index
      %c0_15 = arith.constant 0 : index
      %c0_16 = arith.constant 0 : index
      %11 = vector.load %arg15[%c0_14, %c0_15, %c0_16] : memref<3x8x32xf32, #tpu.memory_space<vmem>>, vector<3x8x32xf32>
      tpu.vector_store %arg15[%c0_14, %c0_15, %c0_16], %10 {strides = array<i32>} : memref<3x8x32xf32, #tpu.memory_space<vmem>>, vector<3x8x32xf32>,
      %c1 = arith.constant 1 : index
      %c0_17 = arith.constant 0 : index
      %c0_18 = arith.constant 0 : index
      %12 = vector.load %arg8[%c1, %c0_17, %c0_18] : memref<2x8x32xf32, #tpu.memory_space<vmem>>, vector<1x8x32xf32>
      %13 = vector.shape_cast %12 : vector<1x8x32xf32> to vector<8x32xf32>
      %14 = arith.truncf %13 : vector<8x32xf32> to vector<8x32xbf16>
      %c0_19 = arith.constant 0 : index
      %c0_20 = arith.constant 0 : index
      %15 = vector.load %arg6[%c0_19, %c0_20] : memref<32x16xbf16, #tpu.memory_space<vmem>>, vector<32x16xbf16>
      %cst_21 = arith.constant dense<0.000000e+00> : vector<8x16xf32>
      %16 = tpu.matmul %14, %15, %cst_21 {dimension_numbers = #tpu.dot_dimension_numbers<[1], [0], [0], [1], [0, 0, 1, 1], [], []>} : vector<8x32xbf16>, vector<32x16xbf16>, vector<8x16xf32> -> vector<8x16xf32>
      %c0_22 = arith.constant 0 : index
      %c0_23 = arith.constant 0 : index
      %17 = vector.load %arg7[%c0_22, %c0_23] : memref<1x16xf32, #tpu.memory_space<vmem>>, vector<1x16xf32>
      %18 = vector.broadcast %17 : vector<1x16xf32> to vector<8x16xf32>
      %19 = arith.addf %16, %18 : vector<8x16xf32>
      %c0_24 = arith.constant 0 : index
      %c0_25 = arith.constant 0 : index
      %c0_26 = arith.constant 0 : index
      %20 = vector.load %arg10[%c0_24, %c0_25, %c0_26] : memref<1x8x16xf32, #tpu.memory_space<vmem>>, vector<1x8x16xf32>
      %21 = vector.shape_cast %20 : vector<1x8x16xf32> to vector<8x16xf32>
      %22 = vector.shape_cast %19 : vector<8x16xf32> to vector<1x8x16xf32>
      tpu.vector_store %arg10[%c0_24, %c0_25, %c0_26], %22 {strides = array<i32>} : memref<1x8x16xf32, #tpu.memory_space<vmem>>, vector<1x8x16xf32>,
      %c0_27 = arith.constant 0 : index
      %c0_28 = arith.constant 0 : index
      %c0_29 = arith.constant 0 : index
      %23 = vector.load %arg11[%c0_27, %c0_28, %c0_29] : memref<1x8x32xf32, #tpu.memory_space<vmem>>, vector<1x8x32xf32>
      %24 = vector.shape_cast %23 : vector<1x8x32xf32> to vector<8x32xf32>
      %25 = vector.shape_cast %13 : vector<8x32xf32> to vector<1x8x32xf32>
      tpu.vector_store %arg11[%c0_27, %c0_28, %c0_29], %25 {strides = array<i32>} : memref<1x8x32xf32, #tpu.memory_space<vmem>>, vector<1x8x32xf32>,
      %c0_30 = arith.constant 0 : index
      %c0_31 = arith.constant 0 : index
      %26 = vector.load %arg14[%c0_30, %c0_31] : memref<8x16xf32, #tpu.memory_space<vmem>>, vector<8x16xf32>
      tpu.vector_store %arg14[%c0_30, %c0_31], %19 {strides = array<i32>} : memref<8x16xf32, #tpu.memory_space<vmem>>, vector<8x16xf32>,
      %c0_32 = arith.constant 0 : index
      %c0_33 = arith.constant 0 : index
      %c0_34 = arith.constant 0 : index
      %27 = vector.load %arg15[%c0_32, %c0_33, %c0_34] : memref<3x8x32xf32, #tpu.memory_space<vmem>>, vector<1x8x32xf32>
      %28 = vector.shape_cast %27 : vector<1x8x32xf32> to vector<8x32xf32>
      %29 = vector.shape_cast %13 : vector<8x32xf32> to vector<1x8x32xf32>
      tpu.vector_store %arg15[%c0_32, %c0_33, %c0_34], %29 {strides = array<i32>} : memref<3x8x32xf32, #tpu.memory_space<vmem>>, vector<1x8x32xf32>,
    } else {
    }
    %c0_i32_1 = arith.constant 0 : i32
    %3 = arith.cmpi sgt, %arg0, %c0_i32_1 : i32
    %4 = arith.extui %3 : i1 to i32
    %c0_i32_2 = arith.constant 0 : i32
    %5 = arith.cmpi ne, %4, %c0_i32_2 : i32
    scf.if %5 {
      %c0 = arith.constant 0 : index
      %c0_3 = arith.constant 0 : index
      %6 = vector.load %arg14[%c0, %c0_3] : memref<8x16xf32, #tpu.memory_space<vmem>>, vector<8x16xf32>
      %7 = arith.truncf %6 : vector<8x16xf32> to vector<8x16xbf16>
      %c0_4 = arith.constant 0 : index
      %c0_5 = arith.constant 0 : index
      %8 = vector.load %arg2[%c0_4, %c0_5] : memref<16x32xbf16, #tpu.memory_space<vmem>>, vector<16x32xbf16>
      %cst = arith.constant dense<0.000000e+00> : vector<8x32xf32>
      %9 = tpu.matmul %7, %8, %cst {dimension_numbers = #tpu.dot_dimension_numbers<[1], [0], [0], [1], [0, 0, 1, 1], [], []>} : vector<8x16xbf16>, vector<16x32xbf16>, vector<8x32xf32> -> vector<8x32xf32>
      %c0_6 = arith.constant 0 : index
      %c0_7 = arith.constant 0 : index
      %10 = vector.load %arg3[%c0_6, %c0_7] : memref<1x32xf32, #tpu.memory_space<vmem>>, vector<1x32xf32>
      %11 = vector.broadcast %10 : vector<1x32xf32> to vector<8x32xf32>
      %12 = arith.addf %9, %11 : vector<8x32xf32>
      %c3_i32 = arith.constant 3 : i32
      %c0_i32_8 = arith.constant 0 : i32
      %13 = arith.cmpi eq, %c3_i32, %c0_i32_8 : i32
      %c1_i32 = arith.constant 1 : i32
      %14 = arith.select %13, %c1_i32, %c3_i32 : i32
      %15 = arith.remsi %arg0, %14 : i32
      %c0_i32_9 = arith.constant 0 : i32
      %16 = arith.cmpi ne, %15, %c0_i32_9 : i32
      %c0_i32_10 = arith.constant 0 : i32
      %17 = arith.cmpi slt, %15, %c0_i32_10 : i32
      %c0_i32_11 = arith.constant 0 : i32
      %18 = arith.cmpi slt, %14, %c0_i32_11 : i32
      %19 = arith.xori %17, %18 : i1
      %20 = arith.andi %19, %16 : i1
      %21 = arith.addi %15, %14 : i32
      %22 = arith.select %20, %21, %15 : i32
      %23 = arith.index_cast %arg0 : i32 to index
      %c0_12 = arith.constant 0 : index
      %24 = memref.load %arg1[%23, %c0_12] : memref<8x2xf32, #tpu.memory_space<smem>>
      %25 = arith.index_cast %arg0 : i32 to index
      %c1 = arith.constant 1 : index
      %26 = memref.load %arg1[%25, %c1] : memref<8x2xf32, #tpu.memory_space<smem>>
      %c1_13 = arith.constant 1 : index
      %c0_14 = arith.constant 0 : index
      %c0_15 = arith.constant 0 : index
      %27 = vector.load %arg12[%c1_13, %c0_14, %c0_15] : memref<2x8x32xf32, #tpu.memory_space<vmem>>, vector<1x8x32xf32>
      %28 = vector.shape_cast %27 : vector<1x8x32xf32> to vector<8x32xf32>
      %29 = vector.broadcast %24 : f32 to vector<8x32xf32>
      %30 = arith.mulf %29, %28 : vector<8x32xf32>
      %31 = arith.index_cast %22 : i32 to index
      %c0_16 = arith.constant 0 : index
      %c0_17 = arith.constant 0 : index
      %32 = vector.load %arg15[%31, %c0_16, %c0_17] : memref<3x8x32xf32, #tpu.memory_space<vmem>>, vector<1x8x32xf32>
      %33 = vector.shape_cast %32 : vector<1x8x32xf32> to vector<8x32xf32>
      %34 = vector.broadcast %26 : f32 to vector<8x32xf32>
      %35 = arith.mulf %34, %33 : vector<8x32xf32>
      %36 = arith.addf %30, %35 : vector<8x32xf32>
      %c1_18 = arith.constant 1 : index
      %c0_19 = arith.constant 0 : index
      %c0_20 = arith.constant 0 : index
      %37 = vector.load %arg12[%c1_18, %c0_19, %c0_20] : memref<2x8x32xf32, #tpu.memory_space<vmem>>, vector<1x8x32xf32>
      %38 = vector.shape_cast %37 : vector<1x8x32xf32> to vector<8x32xf32>
      %39 = vector.shape_cast %36 : vector<8x32xf32> to vector<1x8x32xf32>
      tpu.vector_store %arg12[%c1_18, %c0_19, %c0_20], %39 {strides = array<i32>} : memref<2x8x32xf32, #tpu.memory_space<vmem>>, vector<1x8x32xf32>,
      %c0_21 = arith.constant 0 : index
      %c0_22 = arith.constant 0 : index
      %c0_23 = arith.constant 0 : index
      %40 = vector.load %arg12[%c0_21, %c0_22, %c0_23] : memref<2x8x32xf32, #tpu.memory_space<vmem>>, vector<1x8x32xf32>
      %41 = vector.shape_cast %40 : vector<1x8x32xf32> to vector<8x32xf32>
      %c0_24 = arith.constant 0 : index
      %c0_25 = arith.constant 0 : index
      %c0_26 = arith.constant 0 : index
      %42 = vector.load %arg13[%c0_24, %c0_25, %c0_26] : memref<2x8x32xf32, #tpu.memory_space<vmem>>, vector<1x8x32xf32>
      %43 = vector.shape_cast %42 : vector<1x8x32xf32> to vector<8x32xf32>
      %44 = tpu.concatenate %12, %41 in 1 : vector<8x32xf32>, vector<8x32xf32> -> vector<8x64xf32>
      %45 = arith.truncf %44 : vector<8x64xf32> to vector<8x64xbf16>
      %c0_27 = arith.constant 0 : index
      %c0_28 = arith.constant 0 : index
      %c0_29 = arith.constant 0 : index
      %46 = vector.load %arg4[%c0_27, %c0_28, %c0_29] : memref<2x64x128xbf16, #tpu.memory_space<vmem>>, vector<1x64x128xbf16>
      %47 = vector.shape_cast %46 : vector<1x64x128xbf16> to vector<64x128xbf16>
      %cst_30 = arith.constant dense<0.000000e+00> : vector<8x128xf32>
      %48 = tpu.matmul %45, %47, %cst_30 {dimension_numbers = #tpu.dot_dimension_numbers<[1], [0], [0], [1], [0, 0, 1, 1], [], []>} : vector<8x64xbf16>, vector<64x128xbf16>, vector<8x128xf32> -> vector<8x128xf32>
      %c0_31 = arith.constant 0 : index
      %c0_32 = arith.constant 0 : index
      %c0_33 = arith.constant 0 : index
      %49 = vector.load %arg5[%c0_31, %c0_32, %c0_33] : memref<2x1x128xf32, #tpu.memory_space<vmem>>, vector<1x1x128xf32>
      %50 = vector.shape_cast %49 : vector<1x1x128xf32> to vector<1x128xf32>
      %51 = vector.broadcast %50 : vector<1x128xf32> to vector<8x128xf32>
      %52 = arith.addf %48, %51 : vector<8x128xf32>
      %cst_34 = arith.constant 5.000000e-01 : f32
      %53 = vector.broadcast %cst_34 : f32 to vector<8x128xf32>
      %54 = arith.mulf %53, %52 : vector<8x128xf32>
      %55 = math.tanh %54 : vector<8x128xf32>
      %cst_35 = arith.constant 5.000000e-01 : f32
      %56 = vector.broadcast %cst_35 : f32 to vector<8x128xf32>
      %57 = arith.mulf %56, %55 : vector<8x128xf32>
      %cst_36 = arith.constant 5.000000e-01 : f32
      %58 = vector.broadcast %cst_36 : f32 to vector<8x128xf32>
      %59 = arith.addf %57, %58 : vector<8x128xf32>
      %60 = math.tanh %52 : vector<8x128xf32>
      %61 = vector.extract_strided_slice %59 {offsets = [0, 0], sizes = [8, 32], strides = [1, 1]} : vector<8x128xf32> to vector<8x32xf32>
      %62 = vector.extract_strided_slice %59 {offsets = [0, 32], sizes = [8, 32], strides = [1, 1]} : vector<8x128xf32> to vector<8x32xf32>
      %63 = vector.extract_strided_slice %60 {offsets = [0, 64], sizes = [8, 32], strides = [1, 1]} : vector<8x128xf32> to vector<8x32xf32>
      %64 = vector.extract_strided_slice %59 {offsets = [0, 96], sizes = [8, 32], strides = [1, 1]} : vector<8x128xf32> to vector<8x32xf32>
      %65 = arith.mulf %62, %43 : vector<8x32xf32>
      %66 = arith.mulf %61, %63 : vector<8x32xf32>
      %67 = arith.addf %65, %66 : vector<8x32xf32>
      %68 = math.tanh %67 : vector<8x32xf32>
      %69 = arith.mulf %64, %68 : vector<8x32xf32>
      %c0_37 = arith.constant 0 : index
      %c0_38 = arith.constant 0 : index
      %c0_39 = arith.constant 0 : index
      %70 = vector.load %arg13[%c0_37, %c0_38, %c0_39] : memref<2x8x32xf32, #tpu.memory_space<vmem>>, vector<1x8x32xf32>
      %71 = vector.shape_cast %70 : vector<1x8x32xf32> to vector<8x32xf32>
      %72 = vector.shape_cast %67 : vector<8x32xf32> to vector<1x8x32xf32>
      tpu.vector_store %arg13[%c0_37, %c0_38, %c0_39], %72 {strides = array<i32>} : memref<2x8x32xf32, #tpu.memory_space<vmem>>, vector<1x8x32xf32>,
      %c0_40 = arith.constant 0 : index
      %c0_41 = arith.constant 0 : index
      %c0_42 = arith.constant 0 : index
      %73 = vector.load %arg12[%c0_40, %c0_41, %c0_42] : memref<2x8x32xf32, #tpu.memory_space<vmem>>, vector<1x8x32xf32>
      %74 = vector.shape_cast %73 : vector<1x8x32xf32> to vector<8x32xf32>
      %75 = vector.shape_cast %69 : vector<8x32xf32> to vector<1x8x32xf32>
      tpu.vector_store %arg12[%c0_40, %c0_41, %c0_42], %75 {strides = array<i32>} : memref<2x8x32xf32, #tpu.memory_space<vmem>>, vector<1x8x32xf32>,
      %c1_43 = arith.constant 1 : index
      %c0_44 = arith.constant 0 : index
      %c0_45 = arith.constant 0 : index
      %76 = vector.load %arg12[%c1_43, %c0_44, %c0_45] : memref<2x8x32xf32, #tpu.memory_space<vmem>>, vector<1x8x32xf32>
      %77 = vector.shape_cast %76 : vector<1x8x32xf32> to vector<8x32xf32>
      %c1_46 = arith.constant 1 : index
      %c0_47 = arith.constant 0 : index
      %c0_48 = arith.constant 0 : index
      %78 = vector.load %arg13[%c1_46, %c0_47, %c0_48] : memref<2x8x32xf32, #tpu.memory_space<vmem>>, vector<1x8x32xf32>
      %79 = vector.shape_cast %78 : vector<1x8x32xf32> to vector<8x32xf32>
      %80 = tpu.concatenate %69, %77 in 1 : vector<8x32xf32>, vector<8x32xf32> -> vector<8x64xf32>
      %81 = arith.truncf %80 : vector<8x64xf32> to vector<8x64xbf16>
      %c1_49 = arith.constant 1 : index
      %c0_50 = arith.constant 0 : index
      %c0_51 = arith.constant 0 : index
      %82 = vector.load %arg4[%c1_49, %c0_50, %c0_51] : memref<2x64x128xbf16, #tpu.memory_space<vmem>>, vector<1x64x128xbf16>
      %83 = vector.shape_cast %82 : vector<1x64x128xbf16> to vector<64x128xbf16>
      %cst_52 = arith.constant dense<0.000000e+00> : vector<8x128xf32>
      %84 = tpu.matmul %81, %83, %cst_52 {dimension_numbers = #tpu.dot_dimension_numbers<[1], [0], [0], [1], [0, 0, 1, 1], [], []>} : vector<8x64xbf16>, vector<64x128xbf16>, vector<8x128xf32> -> vector<8x128xf32>
      %c1_53 = arith.constant 1 : index
      %c0_54 = arith.constant 0 : index
      %c0_55 = arith.constant 0 : index
      %85 = vector.load %arg5[%c1_53, %c0_54, %c0_55] : memref<2x1x128xf32, #tpu.memory_space<vmem>>, vector<1x1x128xf32>
      %86 = vector.shape_cast %85 : vector<1x1x128xf32> to vector<1x128xf32>
      %87 = vector.broadcast %86 : vector<1x128xf32> to vector<8x128xf32>
      %88 = arith.addf %84, %87 : vector<8x128xf32>
      %cst_56 = arith.constant 5.000000e-01 : f32
      %89 = vector.broadcast %cst_56 : f32 to vector<8x128xf32>
      %90 = arith.mulf %89, %88 : vector<8x128xf32>
      %91 = math.tanh %90 : vector<8x128xf32>
      %cst_57 = arith.constant 5.000000e-01 : f32
      %92 = vector.broadcast %cst_57 : f32 to vector<8x128xf32>
      %93 = arith.mulf %92, %91 : vector<8x128xf32>
      %cst_58 = arith.constant 5.000000e-01 : f32
      %94 = vector.broadcast %cst_58 : f32 to vector<8x128xf32>
      %95 = arith.addf %93, %94 : vector<8x128xf32>
      %96 = math.tanh %88 : vector<8x128xf32>
      %97 = vector.extract_strided_slice %95 {offsets = [0, 0], sizes = [8, 32], strides = [1, 1]} : vector<8x128xf32> to vector<8x32xf32>
      %98 = vector.extract_strided_slice %95 {offsets = [0, 32], sizes = [8, 32], strides = [1, 1]} : vector<8x128xf32> to vector<8x32xf32>
      %99 = vector.extract_strided_slice %96 {offsets = [0, 64], sizes = [8, 32], strides = [1, 1]} : vector<8x128xf32> to vector<8x32xf32>
      %100 = vector.extract_strided_slice %95 {offsets = [0, 96], sizes = [8, 32], strides = [1, 1]} : vector<8x128xf32> to vector<8x32xf32>
      %101 = arith.mulf %98, %79 : vector<8x32xf32>
      %102 = arith.mulf %97, %99 : vector<8x32xf32>
      %103 = arith.addf %101, %102 : vector<8x32xf32>
      %104 = math.tanh %103 : vector<8x32xf32>
      %105 = arith.mulf %100, %104 : vector<8x32xf32>
      %c1_59 = arith.constant 1 : index
      %c0_60 = arith.constant 0 : index
      %c0_61 = arith.constant 0 : index
      %106 = vector.load %arg13[%c1_59, %c0_60, %c0_61] : memref<2x8x32xf32, #tpu.memory_space<vmem>>, vector<1x8x32xf32>
      %107 = vector.shape_cast %106 : vector<1x8x32xf32> to vector<8x32xf32>
      %108 = vector.shape_cast %103 : vector<8x32xf32> to vector<1x8x32xf32>
      tpu.vector_store %arg13[%c1_59, %c0_60, %c0_61], %108 {strides = array<i32>} : memref<2x8x32xf32, #tpu.memory_space<vmem>>, vector<1x8x32xf32>,
      %c1_62 = arith.constant 1 : index
      %c0_63 = arith.constant 0 : index
      %c0_64 = arith.constant 0 : index
      %109 = vector.load %arg12[%c1_62, %c0_63, %c0_64] : memref<2x8x32xf32, #tpu.memory_space<vmem>>, vector<1x8x32xf32>
      %110 = vector.shape_cast %109 : vector<1x8x32xf32> to vector<8x32xf32>
      %111 = vector.shape_cast %105 : vector<8x32xf32> to vector<1x8x32xf32>
      tpu.vector_store %arg12[%c1_62, %c0_63, %c0_64], %111 {strides = array<i32>} : memref<2x8x32xf32, #tpu.memory_space<vmem>>, vector<1x8x32xf32>,
      %112 = arith.truncf %105 : vector<8x32xf32> to vector<8x32xbf16>
      %c0_65 = arith.constant 0 : index
      %c0_66 = arith.constant 0 : index
      %113 = vector.load %arg6[%c0_65, %c0_66] : memref<32x16xbf16, #tpu.memory_space<vmem>>, vector<32x16xbf16>
      %cst_67 = arith.constant dense<0.000000e+00> : vector<8x16xf32>
      %114 = tpu.matmul %112, %113, %cst_67 {dimension_numbers = #tpu.dot_dimension_numbers<[1], [0], [0], [1], [0, 0, 1, 1], [], []>} : vector<8x32xbf16>, vector<32x16xbf16>, vector<8x16xf32> -> vector<8x16xf32>
      %c0_68 = arith.constant 0 : index
      %c0_69 = arith.constant 0 : index
      %115 = vector.load %arg7[%c0_68, %c0_69] : memref<1x16xf32, #tpu.memory_space<vmem>>, vector<1x16xf32>
      %116 = vector.broadcast %115 : vector<1x16xf32> to vector<8x16xf32>
      %117 = arith.addf %114, %116 : vector<8x16xf32>
      %c0_70 = arith.constant 0 : index
      %c0_71 = arith.constant 0 : index
      %c0_72 = arith.constant 0 : index
      %118 = vector.load %arg10[%c0_70, %c0_71, %c0_72] : memref<1x8x16xf32, #tpu.memory_space<vmem>>, vector<1x8x16xf32>
      %119 = vector.shape_cast %118 : vector<1x8x16xf32> to vector<8x16xf32>
      %120 = vector.shape_cast %117 : vector<8x16xf32> to vector<1x8x16xf32>
      tpu.vector_store %arg10[%c0_70, %c0_71, %c0_72], %120 {strides = array<i32>} : memref<1x8x16xf32, #tpu.memory_space<vmem>>, vector<1x8x16xf32>,
      %c0_73 = arith.constant 0 : index
      %c0_74 = arith.constant 0 : index
      %c0_75 = arith.constant 0 : index
      %121 = vector.load %arg11[%c0_73, %c0_74, %c0_75] : memref<1x8x32xf32, #tpu.memory_space<vmem>>, vector<1x8x32xf32>
      %122 = vector.shape_cast %121 : vector<1x8x32xf32> to vector<8x32xf32>
      %123 = vector.shape_cast %105 : vector<8x32xf32> to vector<1x8x32xf32>
      tpu.vector_store %arg11[%c0_73, %c0_74, %c0_75], %123 {strides = array<i32>} : memref<1x8x32xf32, #tpu.memory_space<vmem>>, vector<1x8x32xf32>,
      %c0_76 = arith.constant 0 : index
      %c0_77 = arith.constant 0 : index
      %124 = vector.load %arg14[%c0_76, %c0_77] : memref<8x16xf32, #tpu.memory_space<vmem>>, vector<8x16xf32>
      tpu.vector_store %arg14[%c0_76, %c0_77], %117 {strides = array<i32>} : memref<8x16xf32, #tpu.memory_space<vmem>>, vector<8x16xf32>,
      %125 = arith.index_cast %22 : i32 to index
      %c0_78 = arith.constant 0 : index
      %c0_79 = arith.constant 0 : index
      %126 = vector.load %arg15[%125, %c0_78, %c0_79] : memref<3x8x32xf32, #tpu.memory_space<vmem>>, vector<1x8x32xf32>
      %127 = vector.shape_cast %126 : vector<1x8x32xf32> to vector<8x32xf32>
      %128 = vector.shape_cast %105 : vector<8x32xf32> to vector<1x8x32xf32>
      tpu.vector_store %arg15[%125, %c0_78, %c0_79], %128 {strides = array<i32>} : memref<3x8x32xf32, #tpu.memory_space<vmem>>, vector<1x8x32xf32>,
    } else {
    }
    return
  }
  func.func @transform_0(%arg0: i32) -> (i32, i32) {
    %c0_i32 = arith.constant 0 : i32
    %c0_i32_0 = arith.constant 0 : i32
    %c0_i32_1 = arith.constant 0 : i32
    return %c0_i32, %c0_i32_0 : i32, i32
  }
  func.func @transform_1(%arg0: i32) -> (i32, i32) {
    %c0_i32 = arith.constant 0 : i32
    %c0_i32_0 = arith.constant 0 : i32
    %c0_i32_1 = arith.constant 0 : i32
    return %c0_i32, %c0_i32_0 : i32, i32
  }
  func.func @transform_2(%arg0: i32) -> (i32, i32) {
    %c0_i32 = arith.constant 0 : i32
    %c0_i32_0 = arith.constant 0 : i32
    %c0_i32_1 = arith.constant 0 : i32
    return %c0_i32, %c0_i32_0 : i32, i32
  }
  func.func @transform_3(%arg0: i32) -> (i32, i32, i32) {
    %c0_i32 = arith.constant 0 : i32
    %c0_i32_0 = arith.constant 0 : i32
    %c0_i32_1 = arith.constant 0 : i32
    %c0_i32_2 = arith.constant 0 : i32
    return %c0_i32, %c0_i32_0, %c0_i32_1 : i32, i32, i32
  }
  func.func @transform_4(%arg0: i32) -> (i32, i32, i32) {
    %c0_i32 = arith.constant 0 : i32
    %c0_i32_0 = arith.constant 0 : i32
    %c0_i32_1 = arith.constant 0 : i32
    %c0_i32_2 = arith.constant 0 : i32
    return %c0_i32, %c0_i32_0, %c0_i32_1 : i32, i32, i32
  }
  func.func @transform_5(%arg0: i32) -> (i32, i32) {
    %c0_i32 = arith.constant 0 : i32
    %c0_i32_0 = arith.constant 0 : i32
    %c0_i32_1 = arith.constant 0 : i32
    return %c0_i32, %c0_i32_0 : i32, i32
  }
  func.func @transform_6(%arg0: i32) -> (i32, i32) {
    %c0_i32 = arith.constant 0 : i32
    %c0_i32_0 = arith.constant 0 : i32
    %c0_i32_1 = arith.constant 0 : i32
    return %c0_i32, %c0_i32_0 : i32, i32
  }
  func.func @transform_7(%arg0: i32) -> (i32, i32, i32) {
    %c0_i32 = arith.constant 0 : i32
    %c0_i32_0 = arith.constant 0 : i32
    %c0_i32_1 = arith.constant 0 : i32
    %c0_i32_2 = arith.constant 0 : i32
    return %c0_i32, %c0_i32_0, %c0_i32_1 : i32, i32, i32
  }
  func.func @transform_8(%arg0: i32) -> (i32, i32, i32) {
    %c0_i32 = arith.constant 0 : i32
    %c0_i32_0 = arith.constant 0 : i32
    %c0_i32_1 = arith.constant 0 : i32
    %c0_i32_2 = arith.constant 0 : i32
    return %c0_i32, %c0_i32_0, %c0_i32_1 : i32, i32, i32
  }
  func.func @transform_9(%arg0: i32) -> (i32, i32, i32) {
    %c0_i32 = arith.constant 0 : i32
    %c0_i32_0 = arith.constant 0 : i32
    %c0_i32_1 = arith.constant 0 : i32
    return %arg0, %c0_i32, %c0_i32_0 : i32, i32, i32
  }
  func.func @transform_10(%arg0: i32) -> (i32, i32, i32) {
    %c0_i32 = arith.constant 0 : i32
    %c0_i32_0 = arith.constant 0 : i32
    %c0_i32_1 = arith.constant 0 : i32
    return %arg0, %c0_i32, %c0_i32_0 : i32, i32, i32
  }
}

</mosaic_0001>

<bundles_post_ra>
// kernel: tpu_custom_call.1
= control target key start
LH: loop header
LB: loop body
LE: loop exit
PB: predicated region body
PF: predicated region fallthrough
CT: control target
= control target key end

     0   :  { %s1598_s0 = inlined_call_operand.vmem [shape: f32[8,2], index: 0, kind: input, shape index: {}]   ;;  %s1599_s1 = inlined_call_operand.vmem [shape: bf16[16,32], index: 1, kind: input, shape index: {}]   ;;  %s1600_s2 = inlined_call_operand.vmem [shape: f32[1,32], index: 2, kind: input, shape index: {}]   ;;  %s1601_s3 = inlined_call_operand.hbm [shape: bf16[2,64,128], index: 3, kind: input, shape index: {}]   ;;  %s1602_s4 = inlined_call_operand.vmem [shape: f32[2,1,128], index: 4, kind: input, shape index: {}]   ;;  %s1603_s5 = inlined_call_operand.vmem [shape: bf16[32,16], index: 5, kind: input, shape index: {}]   ;;  %s1604_s6 = inlined_call_operand.vmem [shape: f32[1,16], index: 6, kind: input, shape index: {}]   ;;  %s1605_s7 = inlined_call_operand.vmem [shape: f32[2,8,32], index: 7, kind: input, shape index: {}]   ;;  %s1606_s8 = inlined_call_operand.hbm [shape: f32[2,8,32], index: 8, kind: input, shape index: {}]   ;;  %s1607_s9 = inlined_call_operand.hbm [shape: f32[8,8,16], index: 9, kind: output, shape index: {0}]   ;;  %s1608_s10 = inlined_call_operand.hbm [shape: f32[8,8,32], index: 10, kind: output, shape index: {1}]  }
   0x1   :  { %1612 = sst [smem:[#allocation24_spill]] %s1598_s0 }
   0x2   :  { %1613 = sst [smem:[#allocation25_spill]] %s1601_s3 }
   0x3   :  { %16 = vsyncpa [#allocation9], 0 }
   0x4   :  { %17 = vsyncpa [#allocation7], 0 }
   0x5   :  { %18 = vsyncpa [#allocation12], 0 }
   0x6   :  { %19 = vsyncpa [#allocation8], 0 }
   0x7   :  { %21 = vsyncpa [#allocation8 + $0x1], 0 }
   0x8   :  { %22 = vsyncpa [#allocation15], 0 }
   0x9   :  { %24 = vsyncpa [#allocation15 + $0x1], 0  ;;  %s1362_s13 = smov 0   ;;  %s1364_s14 = smov 0  }
   0xa   :  { %s1366_s15 = smov 0   ;;  %s1368_s16 = smov 0  }
   0xb LB: > { %1614 = sst [smem:[#allocation21_spill]] %s1290_s15  ;;  %s1383_s17 = sadd.s32 4294967295, %s1294_s16   ;;  %s1294_s16 = sphi %s1368_s16, %s1623_s16   ;;  %s1290_s15 = sphi %s1366_s15, %s1625_s15   ;;  %s1286_s14 = sphi %s1364_s14, %s1627_s14   ;;  %s1282_s13 = sphi %s1362_s13, %s1626_s13  }
   0xc   : > { %s913_s18 = sadd.s32 4294967294, %s1294_s16   ;;  %s1387_s19 = sadd.s32 1, %s1294_s16  }
   0xd   : > { %1615 = sst [smem:[#allocation22_spill]] %s1387_s19  ;;  %s226_s20 = sadd.s32 1, %s1290_s15 }
   0xe   : > { %s223_s21 = ssub.s32 %s1294_s16, %s1387_s19  ;;  %p236_p0 = scmp.ne.s32.totalorder %s1290_s15, %s1286_s14 }
   0xf   : > { %p224_p1 = scmp.eq.s32.totalorder %s223_s21, 0  ;;  %p237_p2 = scmp.eq.s32.totalorder %s1383_s17, 7 }
  0x10   : > { %p242_p3 = scmp.ne.s32.totalorder %s1286_s14, %s1282_s13  ;;  %p243_p4 = scmp.eq.s32.totalorder %s913_s18, 7 }
  0x11   : > { %s1398_s22 = scalar_select %p224_p1, %s1290_s15, %s226_s20  }
  0x12   : > { %p1400_p5 = por %p237_p2, %p236_p0  ;;  %p1404_p6 = por %p243_p4, %p242_p3 }
  0x13   : > { %1616 = sst [smem:[#allocation23_spill]] %s1398_s22  ;;  %p914_p7 = scmp.ge.s32.totalorder %s1294_s16, 1 }
  0x14   : > { %p276_p8 = scmp.lt.s32.totalorder %s1294_s16, 9  ;;  %p915_p9 = scmp.ne.s32.totalorder %s1383_s17, 0 }
  0x15   : > { %p1042_p10 = scmp.eq.s32.totalorder %s1383_s17, 0  ;;  %s1620_s0 = sld [smem:[#allocation24_spill]] }
  0x16   : > { %p1412_p11 = pnand %p914_p7, %p276_p8  ;;  %s1621_s3 = sld [smem:[#allocation25_spill]] }
  0x17   : > { %s1296_s18 = smov [#allocation10]   ;;  %s1297_s21 = smov [#allocation6]  }
  0x18   : > { %p1025_p12 = pneg %p1412_p11  ;;  %s305_s20 = sshll.u32 %s1296_s18, 4  ;;  %s306_s20 = int_to_ptr.vmem [resolvable:$true] %s305_s20 }
  0x19   : > { %s1298_s26 = smov 64   ;;  %s1299_s27 = smov 4  }
  0x1a   : > { %p1426_p13 = pnand %p1042_p10, %p1025_p12  ;;  %s1301_s15 = smov 128  }
  0x1b   : > { %s288_s28 = sshll.u32 %s1620_s0, 4  ;;  %s329_s0 = sshll.u32 %s1606_s8, 4  ;;  %s289_s28 = int_to_ptr.vmem [resolvable:$true] %s288_s28  ;;  %s330_s0 = int_to_ptr.hbm [resolvable:$true] %s329_s0 }
  0x1c   : > { %s303_s11 = sshll.u32 %s1621_s3, 4  ;;  %s1300_s3 = smov [#allocation11]   ;;  %s304_s11 = int_to_ptr.hbm [resolvable:$true] %s303_s11 }
  0x1d   : > { %1028 = dma.vmem_to_smem (!%p1426_p13), %s289_s28, 128, %s1297_s21, [#allocation9]  }
  0x1e   : > { %1031 = dma.hbm_to_vmem [thread:$0]  (!%p1426_p13), %s304_s11, 1024, %s306_s20, [#allocation7], %s1298_s26, %s1298_s26, %s1299_s27  }
  0x1f   : > { %s331_s22 = sshll.u32 %s1300_s3, 4  ;;  %s1302_s19 = smov 8   ;;  %s332_s22 = int_to_ptr.vmem [resolvable:$true] %s331_s22 }
  0x20   : > { %1034 = dma.hbm_to_vmem [thread:$0]  (!%p1426_p13), %s330_s0, 256, %s332_s22, [#allocation12], %s1301_s15, %s1301_s15, %s1302_s19  }
  0x21   : > { %347 = sbr.rel (%p1412_p11) target bundleno = 1658 (0x67a), region = 56 }
  0x26   : > { %1261 = dma.done.wait (%p1042_p10), [#allocation9], 128  }
  0x27   : > { %1263 = vsyncadd (%p1042_p10), [#allocation9], 4294967168 }
  0x28   : > { %1265 = dma.done.wait (%p1042_p10), [#allocation7], 1024  }
  0x29   : > { %1267 = vsyncadd (%p1042_p10), [#allocation7], 4294966272 }
  0x2a   : > { %1269 = dma.done.wait (%p1042_p10), [#allocation12], 256  }
  0x2b   : > { %1271 = vsyncadd (%p1042_p10), [#allocation12], 4294967040 }
  0x2c   : > { %364 = sfence }
  0x2d   : > { %s1454_s0 = sand.u32 1, %s1286_s14   ;;  %401 = sbr.rel (%p915_p9) target bundleno = 192 (0xc0), region = 72 }
  0x2e   : > { %s922_s3 = sshll.u32 %s1454_s0, 3 }
  0x2f   : > { %s1457_s15 = scalar_lea.vmem [#allocation13], %s922_s3  ;;  %s1459_s19 = scalar_lea.vmem [#allocation14], %s922_s3 }
  0x32   : > { %v997_v0 = vld [vmem:[%s1603_s5 + $0x8] sm:$0xff]  ;;  %v402_v1 = vld [vmem:[%s1605_s7] sm:$0xff]  ;;  %vm404_vm0 = vcmask 261120   ;;  %v1303_v6 = vmov 0.0   ;;  %vm453_vm1 = vcmask 130048  }
  0x33   : > { %v403_v2 = vld [vmem:[%s1605_s7 + $0x8] sm:$0xff]  ;;  %405 = vst.msk [vmem:[#allocation2] sm:$0xff] %vm404_vm0, %v402_v1  ;;  %v407_v3 = vld [vmem:[#allocation11] sm:$0xff]  ;;  %446 = vmatpush.bf16.msra.mxu0 %v997_v0 }
  0x34   : > { %v408_v4 = vld [vmem:[#allocation11 + $0x8] sm:$0xff]  ;;  %v996_v5 = vld [vmem:[%s1603_s5] sm:$0xff]  ;;  %406 = vst.msk [vmem:[#allocation2 + $0x8] sm:$0xff] %vm404_vm0, %v403_v2  ;;  %v416_v7 = vpack.c.bf16 %v403_v2, %v403_v2 }
  0x35   : > { %409 = vst.msk [vmem:[#allocation3] sm:$0xff] %vm404_vm0, %v407_v3  ;;  %v1093_v8 = vld [vmem:[%s1604_s6] ss:$0 sm:$0xff] }
  0x36   : > { %410 = vst.msk [vmem:[#allocation3 + $0x8] sm:$0xff] %vm404_vm0, %v408_v4 }
  0x37   : > { %411 = vst.msk [vmem:[#allocation5] sm:$0xff] %vm404_vm0, %v1303_v6  ;;  %447 = vmatpush.bf16.msra.mxu0 %v996_v5 }
  0x38   : > { %412 = vst.msk [vmem:[#allocation5 + $0x8] sm:$0xff] %vm404_vm0, %v1303_v6 }
  0x39   : > { %413 = vst.msk [vmem:[#allocation5 + $0x10] sm:$0xff] %vm404_vm0, %v1303_v6 }
  0x3a   : > { %455 = vst.msk [vmem:[%s1459_s19] sm:$0xff] %vm404_vm0, %v403_v2  ;;  %934 = vmatmul.msk.bf16.vlgmr.msra.gmra.mxu0 %vm404_vm0, %v416_v7 }
  0x3b   : > { %457 = vst.msk [vmem:[#allocation5] sm:$0xff] %vm404_vm0, %v403_v2 }
  0xb7   : > { %v449_v9 = vpop.f32.mrf.mxu0 }
  0xb8   : > { %v450_v10 = vadd.f32 %v1093_v8, %v449_v9 }
  0xba   : > { %454 = vst.msk [vmem:[%s1457_s15] sm:$0xff] %vm453_vm1, %v450_v10 }
  0xbb   : > { %456 = vst.msk [vmem:[#allocation4] sm:$0xff] %vm453_vm1, %v450_v10 }
  0xbf   : > { %v451_v11 = vpop.f32.mrf.mxu0 }
  0xc0 PF: > { %p935_p0 = scmp.le.s32.totalorder %s1383_s17, 0 }
  0xc1   : > { %s1304_s3 = smov (!%p935_p0), 32   ;;  %s1305_s12 = smov (!%p935_p0), 64  }
  0xc2   : > { %461 = sbr.rel (%p935_p0) target bundleno = 1629 (0x65d), region = 76  ;;  %s494_s18 = ssub.s32 (!%p935_p0), 0, %s1383_s17 }
  0xc3   : > { %s941_s20 = smin.u32 (!%p935_p0), %s1383_s17, %s494_s18  ;;  %p493_p1 = scmp.lt.s32.totalorder (!%p935_p0), %s1383_s17, 0 }
  0xc4   : > { %1098 = sdivrem.u32 (!%p935_p0), %s941_s20, 3  ;;  %s944_s29 = sshll.u32 (!%p935_p0), %s1383_s17, 7 }
  0xc5   : > { %s508_s22 = sadd.s32 (!%p935_p0), 1, %s944_s29  ;;  %s507_s25 = sld [smem:[#allocation6 + %s944_s29]] (!%p935_p0) }
  0xc6   : > { %s509_s28 = sld [smem:[#allocation6 + %s508_s22]] (!%p935_p0) }
  0xc7   : > { %v998_v12 = vld [vmem:[%s1599_s1] sm:$0xff]  ;;  %v1002_v16 = vld [vmem:[#allocation10 + $0x18] sm:$0xff]  ;;  %vm476_vm2 = vcmask 130048   ;;  %v1001_v17 = vld [vmem:[#allocation10 + $0x10] sm:$0xff]  ;;  %vm520_vm3 = vcmask 261120   ;;  %vm566_vm4 = vcmask 523264  }
  0xc8   : > { %v462_v13 = vld [vmem:[#allocation4] sm:$0xff]  ;;  %487 = vmatpush.bf16.msra.mxu0 %v998_v12  ;;  %574 = vmatpush.bf16.msra.mxu1 %v1002_v16  ;;  %v1000_v18 = vld [vmem:[#allocation10 + $0x8] sm:$0xff]  ;;  %v523_v20 = vld [vmem:[#allocation3] sm:$0xff] }
  0xc9   : > { %v522_v14 = vld [vmem:[#allocation2] sm:$0xff]  ;;  %v463_v15 = vpack.c.bf16 %v462_v13, %v462_v13  ;;  %589 = vrot.lane.b32.xlu1 %v523_v20, %s1304_s3  ;;  %v511_v39 = vld [vmem:[#allocation2 + $0x8] sm:$0xff]  ;;  %v1006_v52 = vld [vmem:[#allocation10 + $0x38] sm:$0xff] }
  0xca   : > { %525 = vrot.lane.b32.xlu0 %v522_v14, %s1304_s3  ;;  %v999_v19 = vld [vmem:[#allocation10] sm:$0xff]  ;;  %673 = vmatpush.bf16.msra.mxu2 %v1006_v52  ;;  %v1005_v53 = vld [vmem:[#allocation10 + $0x30] sm:$0xff]  ;;  %v1004_v54 = vld [vmem:[#allocation10 + $0x28] sm:$0xff] }
  0xcb   : > { %940 = vmatmul.msk.bf16.vlgmr.msra.gmra.mxu0 %vm476_vm2, %v463_v15  ;;  %v1094_v21 = vld [vmem:[%s1600_s2] ss:$0 sm:$0xff]  ;;  %v512_v40 = vstv %s507_s25  ;;  %v621_v58 = vld [vmem:[#allocation3 + $0x8] sm:$0xff]  ;;  %v1096_v63 = vld [vmem:[%s1602_s4 + $0x1] ss:$0 sm:$0xff] }
  0xcc   : > { %575 = vmatpush.bf16.msra.mxu1 %v1001_v17  ;;  %v1095_v28 = vld [vmem:[%s1602_s4] ss:$0 sm:$0xff]  ;;  %v517_v42 = vstv %s509_s28  ;;  %v513_v43 = vmul.f32 %v512_v40, %v511_v39  ;;  %v1008_v16 = vld [vmem:[%s1603_s5 + $0x8] sm:$0xff] }
  0xcd   : > { %s1099_s21 = spop.drf %1098  ;;  %v1003_v57 = vld [vmem:[#allocation10 + $0x20] sm:$0xff]  ;;  %751 = vmatpush.bf16.msra.mxu3 %v1008_v16 }
  0xce   : > { %s1100_s26 = spop.drf %1098  ;;  %674 = vmatpush.bf16.msra.mxu2 %v1005_v53  ;;  %v1007_v17 = vld [vmem:[%s1603_s5] sm:$0xff] }
  0xcf   : > { %s498_s27 = ssub.s32 0, %s1100_s26 }
  0xd0   : > { %576 = vmatpush.bf16.msra.mxu1 %v1000_v18  ;;  %s1629_s27 = smov (!%p493_p1, %s498_s27), %s1100_s26  ;;  %s1306_s26 = smov 96  }
  0xd1   : > { %p943_p2 = scmp.lt.s32.totalorder %s1629_s27, 0  ;;  %s504_s30 = sadd.s32 3, %s1629_s27  ;;  %752 = vmatpush.bf16.msra.mxu3 %v1007_v17 }
  0xd2   : > { %675 = vmatpush.bf16.msra.mxu2 %v1004_v54 }
  0xd3   : > { %s1631_s30 = smov (!%p943_p2, %s504_s30), %s1629_s27 }
  0xd4   : > { %577 = vmatpush.bf16.msra.mxu1 %v999_v19  ;;  %s945_s11 = sshll.u32 %s1631_s30, 3 }
  0xd5   : > { %s1511_s18 = scalar_lea.vmem [#allocation5], %s945_s11 }
  0xd6   : > { %v516_v41 = vld [vmem:[%s1511_s18] sm:$0xff]  ;;  %676 = vmatpush.bf16.msra.mxu2 %v1003_v57 }
  0xd7   : > { %v518_v44 = vmul.f32 %v517_v42, %v516_v41 }
  0xd9   : > { %v519_v45 = vadd.f32 %v518_v44, %v513_v43 }
  0xdb   : > { %521 = vst.msk [vmem:[#allocation2 + $0x8] sm:$0xff] %vm520_vm3, %v519_v45 }
  0xe2   : > { %v619_v46 = vld [vmem:[#allocation2 + $0x8] sm:$0xff] }
 0x13b   : > { %v590_v47 = vpop.permute.xlu1 %589 }
 0x13c   : > { %v526_v23 = vpop.permute.xlu0 %525 }
 0x148   : > { %v489_v22 = vpop.f32.mrf.mxu0 }
 0x149   : > { %v490_v24 = vadd.f32 %v1094_v21, %v489_v22 }
 0x14b   : > { %v528_v25 = vsel %vm520_vm3, %v490_v24, %v526_v23  ;;  %v1097_v24 = vld [vmem:[%s1604_s6] ss:$0 sm:$0xff] }
 0x14c   : > { %v529_v26 = vpack.c.bf16 %v528_v25, %v528_v25 }
 0x14e   : > { %962 = vmatmul.msk.bf16.vlgmr.msra.gmra.mxu1 %vm566_vm4, %v529_v26 }
 0x150   : > { %v491_v27 = vpop.f32.mrf.mxu0 }
 0x1cb   : > { %v579_v29 = vpop.f32.mrf.mxu1 }
 0x1cc   : > { %v580_v30 = vadd.f32 %v1095_v28, %v579_v29 }
 0x1ce   : > { %1101 = vtanh.f32 %v580_v30  ;;  %v583_v33 = vmul.f32 0.5, %v580_v30 }
 0x1d0   : > { %1103 = vtanh.f32 %v583_v33 }
 0x1d3   : > { %v581_v31 = vpop.f32.mrf.mxu1 }
 0x1d4   : > { %v1102_v32 = vpop.eup %1101 }
 0x1d5   : > { %594 = vrot.lane.b32.xlu0 %v1102_v32, %s1305_s12 }
 0x1d6   : > { %v1104_v34 = vpop.eup %1103 }
 0x1d7   : > { %v585_v35 = vmul.f32 0.5, %v1104_v34 }
 0x1d9   : > { %v586_v36 = vadd.f32 0.5, %v585_v35 }
 0x1db   : > { %v592_v48 = vmul.f32 %v590_v47, %v586_v36 }
 0x1dd   : > { %623 = vrot.lane.b32.xlu0 %v619_v46, %s1304_s3 }
 0x247   : > { %v595_v37 = vpop.permute.xlu0 %594 }
 0x248   : > { %v597_v38 = vmul.f32 %v595_v37, %v586_v36 }
 0x24a   : > { %599 = vrot.lane.b32.xlu1 %v597_v38, %s1304_s3 }
 0x24f   : > { %v624_v59 = vpop.permute.xlu0 %623 }
 0x2bc   : > { %v600_v49 = vpop.permute.xlu1 %599 }
 0x2bd   : > { %v602_v50 = vadd.f32 %v600_v49, %v592_v48 }
 0x2bf   : > { %1105 = vtanh.f32 %v602_v50 }
 0x2c5   : > { %v1106_v51 = vpop.eup %1105 }
 0x2c6   : > { %605 = vrot.lane.b32.xlu2 %v1106_v51, %s1305_s12 }
 0x320   : > { %v606_v55 = vpop.permute.xlu2 %605 }
 0x321   : > { %v608_v56 = vmul.f32 %v606_v55, %v586_v36 }
 0x323   : > { %615 = vrot.lane.b32.xlu2 %v608_v56, %s1304_s3 }
 0x32b   : > { %688 = vrot.lane.b32.xlu2 %v621_v58, %s1304_s3 }
 0x37d   : > { %v616_v60 = vpop.permute.xlu2 %615 }
 0x37e   : > { %618 = vst.msk [vmem:[#allocation2] sm:$0xff] %vm520_vm3, %v616_v60  ;;  %v626_v61 = vsel %vm520_vm3, %v616_v60, %v624_v59 }
 0x37f   : > { %v627_v62 = vpack.c.bf16 %v626_v61, %v626_v61 }
 0x381   : > { %980 = vmatmul.msk.bf16.vlgmr.msra.gmra.mxu2 %vm566_vm4, %v627_v62 }
 0x385   : > { %v689_v10 = vpop.permute.xlu2 %688 }
 0x404   : > { %v678_v0 = vpop.f32.mrf.mxu2 }
 0x405   : > { %v679_v1 = vadd.f32 %v1096_v63, %v678_v0 }
 0x407   : > { %1107 = vtanh.f32 %v679_v1  ;;  %v682_v4 = vmul.f32 0.5, %v679_v1 }
 0x409   : > { %1109 = vtanh.f32 %v682_v4 }
 0x40c   : > { %v680_v2 = vpop.f32.mrf.mxu2 }
 0x40d   : > { %v1108_v3 = vpop.eup %1107 }
 0x40e   : > { %693 = vrot.lane.b32.xlu1 %v1108_v3, %s1305_s12 }
 0x40f   : > { %v1110_v5 = vpop.eup %1109 }
 0x410   : > { %v684_v6 = vmul.f32 0.5, %v1110_v5 }
 0x412   : > { %v685_v7 = vadd.f32 0.5, %v684_v6 }
 0x414   : > { %v691_v11 = vmul.f32 %v689_v10, %v685_v7 }
 0x480   : > { %v694_v8 = vpop.permute.xlu1 %693 }
 0x481   : > { %v696_v9 = vmul.f32 %v694_v8, %v685_v7 }
 0x483   : > { %698 = vrot.lane.b32.xlu0 %v696_v9, %s1304_s3 }
 0x48b   : > { %610 = vrot.lane.b32.xlu0 %v602_v50, %s1306_s26 }
 0x4f5   : > { %v699_v12 = vpop.permute.xlu0 %698 }
 0x4f6   : > { %v701_v13 = vadd.f32 %v699_v12, %v691_v11 }
 0x4f8   : > { %1111 = vtanh.f32 %v701_v13 }
 0x4fd   : > { %v611_v14 = vpop.permute.xlu0 %610 }
 0x4fe   : > { %v1112_v15 = vpop.eup %1111  ;;  %613 = vst.msk [vmem:[#allocation3] sm:$0xff] %vm520_vm3, %v611_v14 }
 0x4ff   : > { %704 = vrot.lane.b32.xlu1 %v1112_v15, %s1305_s12 }
 0x507   : > { %709 = vrot.lane.b32.xlu1 %v701_v13, %s1306_s26 }
 0x571   : > { %v705_v18 = vpop.permute.xlu1 %704 }
 0x572   : > { %v707_v19 = vmul.f32 %v705_v18, %v685_v7 }
 0x574   : > { %v718_v20 = vpack.c.bf16 %v707_v19, %v707_v19 }
 0x576   : > { %728 = vrot.lane.b32.xlu2 %v718_v20, %s1304_s3 }
 0x579   : > { %v710_v21 = vpop.permute.xlu1 %709 }
 0x57a   : > { %712 = vst.msk [vmem:[#allocation3 + $0x8] sm:$0xff] %vm520_vm3, %v710_v21 }
 0x57e   : > { %714 = vrot.lane.b32.xlu2 %v707_v19, %s1304_s3 }
 0x5d0   : > { %v729_v22 = vpop.permute.xlu2 %728 }
 0x5d1   : > { %989 = vmatmul.msk.bf16.vlgmr.msra.gmra.mxu3 %vm520_vm3, %v729_v22 }
 0x5d8   : > { %v715_v23 = vpop.permute.xlu2 %714 }
 0x5d9   : > { %717 = vst.msk [vmem:[#allocation2 + $0x8] sm:$0xff] %vm520_vm3, %v715_v23 }
 0x5da   : > { %759 = vst.msk [vmem:[%s1459_s19] sm:$0xff] %vm520_vm3, %v715_v23 }
 0x5db   : > { %761 = vst.msk [vmem:[%s1511_s18] sm:$0xff] %vm520_vm3, %v715_v23 }
 0x654   : > { %v754_v25 = vpop.f32.mrf.mxu3 }
 0x655   : > { %v755_v26 = vadd.f32 %v1097_v24, %v754_v25 }
 0x657   : > { %758 = vst.msk [vmem:[%s1457_s15] sm:$0xff] %vm476_vm2, %v755_v26 }
 0x658   : > { %760 = vst.msk [vmem:[#allocation4] sm:$0xff] %vm476_vm2, %v755_v26 }
 0x65c   : > { %v756_v27 = vpop.f32.mrf.mxu3 }
 0x65d PF: > { %s992_s3 = sshll.u32 %s1383_s17, 3  ;;  %s780_s20 = sshll.u32 %s1457_s15, 4  ;;  %s781_s20 = int_to_ptr.vmem [resolvable:$true] %s780_s20 }
 0x65e   : > { %s778_s18 = scalar_lea.hbm %s1607_s9, %s992_s3  ;;  %s763_s26 = scalar_lea.sflag [#allocation8], %s1454_s0 }
 0x65f   : > { %s782_s21 = sshll.u32 %s778_s18, 4  ;;  %s1208_s17 = scalar_lea.hbm %s1607_s9, 64  ;;  %s783_s21 = int_to_ptr.hbm [resolvable:$true] %s782_s21 }
 0x660   : > { %s1202_s27 = sshra.s32 %s783_s21, 4  ;;  %s1203_s27 = int_to_ptr.hbm [resolvable:$true] %s1202_s27 }
 0x661   : > { %s1204_s29 = scalar_lea.hbm %s1203_s27, 8  ;;  %p1209_p8 = scmp.lt.s32.totalorder %s1203_s27, %s1607_s9 }
 0x662   : > { %p1205_p3 = scmp.ne.s32.totalorder %s1203_s27, %s1204_s29  ;;  %p1210_p9 = scmp.lt.s32.totalorder %s1208_s17, %s1204_s29 }
 0x664   : > { %p1206_p4 = pnand %p1205_p3, %p1400_p5  ;;  %p1211_p10 = por %p1210_p9, %p1209_p8 }
 0x666   : > { %p1207_p7 = pneg %p1206_p4 }
 0x668   : > { %p1212_p11 = pnand %p1211_p10, %p1207_p7 }
 0x66a   : > { %1215 = shalt.err (!%p1212_p11)
}
 0x66b   : > { %1021 = dma.vmem_to_hbm [thread:$0]  (%p1400_p5), %s781_s20, 128, %s783_s21, %s763_s26  }
 0x66c   : > { %s792_s11 = scalar_lea.hbm %s1608_s10, %s992_s3  ;;  %s794_s18 = sshll.u32 %s1459_s19, 4  ;;  %s795_s18 = int_to_ptr.vmem [resolvable:$true] %s794_s18 }
 0x66d   : > { %s796_s30 = sshll.u32 %s792_s11, 4  ;;  %s768_s22 = scalar_lea.sflag [#allocation15], %s1454_s0  ;;  %s797_s30 = int_to_ptr.hbm [resolvable:$true] %s796_s30 }
 0x66e   : > { %s1230_s27 = sshra.s32 %s797_s30, 4  ;;  %s1236_s20 = scalar_lea.hbm %s1608_s10, 64  ;;  %s1231_s27 = int_to_ptr.hbm [resolvable:$true] %s1230_s27 }
 0x66f   : > { %s1232_s29 = scalar_lea.hbm %s1231_s27, 8  ;;  %p1237_p1 = scmp.lt.s32.totalorder %s1231_s27, %s1608_s10 }
 0x670   : > { %p1233_p12 = scmp.ne.s32.totalorder %s1231_s27, %s1232_s29  ;;  %p1238_p2 = scmp.lt.s32.totalorder %s1236_s20, %s1232_s29 }
 0x672   : > { %p1234_p13 = pnand %p1233_p12, %p1400_p5  ;;  %p1239_p3 = por %p1238_p2, %p1237_p1 }
 0x674   : > { %p1235_p0 = pneg %p1234_p13 }
 0x676   : > { %p1240_p4 = pnand %p1239_p3, %p1235_p0 }
 0x678   : > { %1243 = shalt.err (!%p1240_p4)
}
 0x679   : > { %1022 = dma.vmem_to_hbm [thread:$0]  (%p1400_p5), %s795_s18, 128, %s797_s30, %s768_s22  }
 0x67a PF: > { %p1048_p7 = scmp.ge.s32.totalorder %s1294_s16, 2  ;;  %s808_s0 = sand.u32 1, %s1282_s13  }
 0x67b   : > { %s809_s19 = scalar_lea.sflag [#allocation8], %s808_s0 }
 0x67c   : > { %p1036_p8 = pnand %p1048_p7, %p1404_p6 }
 0x67e   : > { %p1037_p9 = pneg %p1036_p8 }
 0x680   : > { %1273 = dma.done.wait (%p1037_p9), %s809_s19, 128  }
 0x681   : > { %1275 = vsyncadd (%p1037_p9), %s809_s19, 4294967168  ;;  %s819_s3 = scalar_lea.sflag [#allocation15], %s808_s0 }
 0x682   : > { %1277 = dma.done.wait (%p1037_p9), %s819_s3, 128  }
 0x683   : > { %1279 = vsyncadd (%p1037_p9), %s819_s3, 4294967168  ;;  %s1623_s16 = sld [smem:[#allocation22_spill]]  ;;  %s1626_s13 = smov %s1286_s14 }
 0x684   : > { %s1624_s25 = sld [smem:[#allocation21_spill]] }
 0x685   : > { %s1625_s15 = sld [smem:[#allocation23_spill]] }
 0x689   : > { %p27_p5 = scmp.ge.s32.totalorder %s1623_s16, 10  }
 0x68a   : > { %s1627_s14 = smov %s1624_s25 }
 0x68b   :  { %29 = sbr.rel (!%p27_p5) target bundleno = 11 (0xb), region = 133 }
 0x690   :  { %825 = vsyncpa [#allocation7], 1 }
 0x691   :  { %827 = vsyncpa [#allocation7 + $0x1], 1 }
 0x692   :  { %828 = vsyncpa [#allocation12], 1 }
 0x693   :  { %829 = vsyncpa [#allocation8], 1 }
 0x694   :  { %831 = vsyncpa [#allocation8 + $0x1], 1 }
 0x695   :  { %832 = vsyncpa [#allocation15], 1 }
 0x696   :  { %834 = vsyncpa [#allocation15 + $0x1], 1 }
 0x697   :  { %835 = vsyncpa [#allocation9], 1 }
 0x698   :  { %837 = vsyncpa [#allocation9 + $0x1], 1 }

</bundles_post_ra>
